<compile_context>
chip_gen: v7x
topology: tpu7x:2x2x1
jax: 0.10.0
libtpu: 0.0.40
codegen_flags: <defaults>
</compile_context>

<pallas_src>
import jax
import jax.numpy as jnp
from jax.experimental import pallas as pl
from jax.experimental.pallas import tpu as pltpu

EPS = 1e-5
LANE = 128


def basic_block_kernel(x_ref, w_ref, bn_ref, o_ref):
    """conv3x3 -> bn -> relu -> conv3x3 -> bn -> +identity -> relu (1 image).

    Lane-packed layouts (wc = W*C padded to a multiple of 128):
      x_ref : (1, H+2, wc) bf16  -- one zero y-halo row on each side
      w_ref : (6, wc, wc)  bf16  -- banded per-ky conv matrices (rows 0-2:
                                    conv1, 3-5: conv2); x-padding folded in
      bn_ref: (4, wc)      f32   -- rows: s1, b1, s2, b2 (BN folded to
                                    scale/bias, tiled per-channel over W)
      o_ref : (1, H, wc)   bf16
    """
    _, hp, wc = x_ref.shape
    H = hp - 2

    xb = x_ref[0]                                   # (H+2, wc) bf16
    bn = bn_ref[...]                                # (4, wc)  f32

    # ---- conv1: three per-ky matmuls (K = wc), accumulated in f32 ----------
    acc1 = jnp.dot(xb[0:H], w_ref[0], preferred_element_type=jnp.float32)
    acc1 = acc1 + jnp.dot(xb[1:H + 1], w_ref[1],
                          preferred_element_type=jnp.float32)
    acc1 = acc1 + jnp.dot(xb[2:H + 2], w_ref[2],
                          preferred_element_type=jnp.float32)

    # ---- bn1 + relu (f32 epilogue), single cast of h to bf16 ---------------
    h = jnp.maximum(acc1 * bn[0:1, :] + bn[1:2, :], 0.0).astype(jnp.bfloat16)
    zrow = jnp.zeros((1, wc), jnp.bfloat16)
    h_pad = jnp.concatenate([zrow, h, zrow], axis=0)            # (H+2, wc)

    # ---- conv2: same three-matmul structure ---------------------------------
    acc2 = jnp.dot(h_pad[0:H], w_ref[3], preferred_element_type=jnp.float32)
    acc2 = acc2 + jnp.dot(h_pad[1:H + 1], w_ref[4],
                          preferred_element_type=jnp.float32)
    acc2 = acc2 + jnp.dot(h_pad[2:H + 2], w_ref[5],
                          preferred_element_type=jnp.float32)

    # ---- bn2 + residual add + relu; lane-dense bf16 store -------------------
    identity = xb[1:H + 1].astype(jnp.float32)
    out = jnp.maximum(acc2 * bn[2:3, :] + bn[3:4, :] + identity, 0.0)
    o_ref[...] = out.astype(o_ref.dtype).reshape(1, H, wc)


def _banded_conv_matrices(w_hwio, W, wc_pad):
    """(3,3,C,C) HWIO weight -> (3, wc_pad, wc_pad) block-tridiagonal bf16.

    M_ky[xi*C+ci, xo*C+co] = w[ky, xi-xo+1, ci, co] if |xi-xo| <= 1 else 0,
    so packed-row y of the input matmul'd with M_ky is exactly kernel-row ky's
    contribution to the SAME-padded 3x3 conv (x-padding folded into the band).
    """
    C = w_hwio.shape[2]
    wc = W * C
    mats = []
    for ky in range(3):
        m = jnp.zeros((wc, wc), jnp.float32)
        for kx in range(3):
            shift = jnp.eye(W, dtype=jnp.float32, k=-(kx - 1))
            m = m + jnp.kron(shift, w_hwio[ky, kx].astype(jnp.float32))
        mats.append(jnp.pad(m, ((0, wc_pad - wc), (0, wc_pad - wc))))
    return jnp.stack(mats).astype(jnp.bfloat16)


def _fold_bn(gamma, beta, mean, var, W, wc_pad):
    """Fold eval-mode BN into scale/bias, tiled over W and lane-padded."""
    inv = gamma / jnp.sqrt(var + EPS)
    s = jnp.tile(inv, W)
    b = jnp.tile(beta - mean * inv, W)
    pad = wc_pad - s.shape[0]
    return (jnp.pad(s, (0, pad)).astype(jnp.float32),
            jnp.pad(b, (0, pad)).astype(jnp.float32))


@jax.jit
def basic_block(x_nhwc, w1_hwio, w2_hwio, g1, be1, m1, v1, g2, be2, m2, v2):
    """Wrapper: packs (W,C) onto lanes, folds BN, builds banded conv matrices,
    and launches the Pallas kernel over a batch grid."""
    N, H, W, C = x_nhwc.shape
    assert w1_hwio.shape == (3, 3, C, C) and w2_hwio.shape == (3, 3, C, C), \
        "requires stride=1, inplanes == planes, no downsample branch"

    WC = W * C
    wc_pad = ((WC + LANE - 1) // LANE) * LANE     # 128 exactly for W=16, C=8

    # Pack (W, C) onto the lane axis (w-major, c-minor); bf16 halves HBM read.
    x_packed = x_nhwc.astype(jnp.bfloat16).reshape(N, H, WC)
    x_p = jnp.pad(x_packed, ((0, 0), (1, 1), (0, wc_pad - WC)))   # y halo of 1

    w_all = jnp.concatenate([_banded_conv_matrices(w1_hwio, W, wc_pad),
                             _banded_conv_matrices(w2_hwio, W, wc_pad)], axis=0)
    s1, b1 = _fold_bn(g1, be1, m1, v1, W, wc_pad)
    s2, b2 = _fold_bn(g2, be2, m2, v2, W, wc_pad)
    bn_all = jnp.stack([s1, b1, s2, b2], axis=0)

    flops = 2 * 6 * N * H * wc_pad * wc_pad
    bytes_accessed = (int(x_p.size) + N * H * wc_pad) * 2 \
        + int(w_all.size) * 2 + int(bn_all.size) * 4

    out = pl.pallas_call(
        basic_block_kernel,
        out_shape=jax.ShapeDtypeStruct((N, H, wc_pad), jnp.bfloat16),
        grid=(N,),
        in_specs=[
            pl.BlockSpec((1, H + 2, wc_pad), lambda n: (n, 0, 0)),
            pl.BlockSpec((6, wc_pad, wc_pad), lambda n: (0, 0, 0)),  # resident
            pl.BlockSpec((4, wc_pad), lambda n: (0, 0)),             # resident
        ],
        out_specs=pl.BlockSpec((1, H, wc_pad), lambda n: (n, 0, 0)),
        compiler_params=pltpu.CompilerParams(
            dimension_semantics=("parallel",)),
        cost_estimate=pl.CostEstimate(
            flops=flops, transcendentals=0, bytes_accessed=bytes_accessed),
    )(x_p, w_all, bn_all)

    return out[:, :, :WC].reshape(N, H, W, C)


def ref_forward(x, w1, w2, g1, be1, m1, v1, g2, be2, m2, v2,
                conv_dtype=jnp.float32):
    """Pure-JAX reference (eval-mode BN). conv_dtype models MXU operand dtype."""
    def conv(a, w):
        return jax.lax.conv_general_dilated(
            a.astype(conv_dtype), w.astype(conv_dtype),
            window_strides=(1, 1), padding="SAME",
            dimension_numbers=("NHWC", "HWIO", "NHWC"),
            preferred_element_type=jnp.float32)

    def bn(a, g, b, m, v):
        return (a - m) / jnp.sqrt(v + EPS) * g + b

    h = jax.nn.relu(bn(conv(x, w1), g1, be1, m1, v1))
    o = bn(conv(h, w2), g2, be2, m2, v2) + x
    return jax.nn.relu(o)


if __name__ == "__main__":
    # BasicBlock(inplanes=8, planes=8, stride=1, downsample=None),
    # input NCHW = (2, 8, 16, 16)  ->  W*C = 128 (one full lane slab).
    N, C, H, W = 2, 8, 16, 16
    key = jax.random.PRNGKey(0)
    kx, kw1, kw2, kg1, kb1, km1, kv1, kg2, kb2, km2, kv2 = jax.random.split(key, 11)

    x_nchw = jax.random.normal(kx, (N, C, H, W), jnp.float32)
    x_nhwc = jnp.transpose(x_nchw, (0, 2, 3, 1))

    # conv3x3 weights (no bias), generated directly in HWIO layout.
    w1 = 0.1 * jax.random.normal(kw1, (3, 3, C, C), jnp.float32)
    w2 = 0.1 * jax.random.normal(kw2, (3, 3, C, C), jnp.float32)

    # BatchNorm parameters / running stats (deterministic synthetic values).
    g1 = 1.0 + 0.1 * jax.random.normal(kg1, (C,), jnp.float32)
    be1 = 0.1 * jax.random.normal(kb1, (C,), jnp.float32)
    m1 = 0.1 * jax.random.normal(km1, (C,), jnp.float32)
    v1 = 1.0 + 0.1 * jax.random.uniform(kv1, (C,), jnp.float32)
    g2 = 1.0 + 0.1 * jax.random.normal(kg2, (C,), jnp.float32)
    be2 = 0.1 * jax.random.normal(kb2, (C,), jnp.float32)
    m2 = 0.1 * jax.random.normal(km2, (C,), jnp.float32)
    v2 = 1.0 + 0.1 * jax.random.uniform(kv2, (C,), jnp.float32)

    out_nhwc = basic_block(x_nhwc, w1, w2, g1, be1, m1, v1, g2, be2, m2, v2)
    out_nhwc = jax.block_until_ready(out_nhwc)

    # References: bf16-operand (matches the kernel's MXU precision, f32 accum)
    # and pure f32 (PyTorch semantics, checked with bf16-appropriate tolerance;
    # kernel additionally stores the output and residual in bf16).
    ref_bf16 = ref_forward(x_nhwc, w1, w2, g1, be1, m1, v1, g2, be2, m2, v2,
                           conv_dtype=jnp.bfloat16)
    ref_f32 = ref_forward(x_nhwc, w1, w2, g1, be1, m1, v1, g2, be2, m2, v2,
                          conv_dtype=jnp.float32)

    # Back to NCHW to match the PyTorch module's output convention.
    out_nchw = jnp.transpose(out_nhwc, (0, 3, 1, 2)).astype(jnp.float32)
    ref_bf16_nchw = jnp.transpose(ref_bf16, (0, 3, 1, 2))
    ref_f32_nchw = jnp.transpose(ref_f32, (0, 3, 1, 2))

    assert out_nchw.shape == (N, C, H, W)
    assert jnp.allclose(out_nchw, ref_bf16_nchw, atol=5e-2, rtol=5e-2), (
        float(jnp.max(jnp.abs(out_nchw - ref_bf16_nchw))))
    # Looser bound vs full-f32 reference (bf16 MXU operands + bf16 output).
    assert jnp.allclose(out_nchw, ref_f32_nchw, atol=1.5e-1, rtol=1.5e-1), (
        float(jnp.max(jnp.abs(out_nchw - ref_f32_nchw))))
    print("KERNEL_OK")
</pallas_src>

<mosaic_0001>
module attributes {stable_mosaic.version = 11 : i64} {
  func.func @basic_block_kernel(%arg0: i32, %arg1: memref<1x18x128xbf16, #tpu.memory_space<vmem>>, %arg2: memref<6x128x128xbf16, #tpu.memory_space<vmem>>, %arg3: memref<4x128xf32, #tpu.memory_space<vmem>>, %arg4: memref<1x16x128xbf16, #tpu.memory_space<vmem>>) attributes {dimension_semantics = [#tpu.dimension_semantics<parallel>], iteration_bounds = array<i64: 2>, scalar_prefetch = 0 : i64, scratch_operands = 0 : i64, tpu.core_type = #tpu.core_type<tc>, window_params = [{transform_indices = @transform_0, window_bounds = array<i64: 1, 18, 128>}, {pipeline_mode = #tpu.pipeline_mode<synchronous>, transform_indices = @transform_1, window_bounds = array<i64: 6, 128, 128>}, {pipeline_mode = #tpu.pipeline_mode<synchronous>, transform_indices = @transform_2, window_bounds = array<i64: 4, 128>}, {transform_indices = @transform_3, window_bounds = array<i64: 1, 16, 128>}]} {
    %c0 = arith.constant 0 : index
    %c0_0 = arith.constant 0 : index
    %c0_1 = arith.constant 0 : index
    %0 = vector.load %arg1[%c0, %c0_0, %c0_1] : memref<1x18x128xbf16, #tpu.memory_space<vmem>>, vector<1x18x128xbf16>
    %1 = vector.shape_cast %0 : vector<1x18x128xbf16> to vector<18x128xbf16>
    %c0_2 = arith.constant 0 : index
    %c0_3 = arith.constant 0 : index
    %2 = vector.load %arg3[%c0_2, %c0_3] : memref<4x128xf32, #tpu.memory_space<vmem>>, vector<4x128xf32>
    %3 = vector.extract_strided_slice %1 {offsets = [0, 0], sizes = [16, 128], strides = [1, 1]} : vector<18x128xbf16> to vector<16x128xbf16>
    %c0_4 = arith.constant 0 : index
    %c0_5 = arith.constant 0 : index
    %c0_6 = arith.constant 0 : index
    %4 = vector.load %arg2[%c0_4, %c0_5, %c0_6] : memref<6x128x128xbf16, #tpu.memory_space<vmem>>, vector<1x128x128xbf16>
    %5 = vector.shape_cast %4 : vector<1x128x128xbf16> to vector<128x128xbf16>
    %cst = arith.constant dense<0.000000e+00> : vector<16x128xf32>
    %6 = tpu.matmul %3, %5, %cst {dimension_numbers = #tpu.dot_dimension_numbers<[1], [0], [0], [1], [0, 0, 1, 1], [], []>} : vector<16x128xbf16>, vector<128x128xbf16>, vector<16x128xf32> -> vector<16x128xf32>
    %7 = vector.extract_strided_slice %1 {offsets = [1, 0], sizes = [16, 128], strides = [1, 1]} : vector<18x128xbf16> to vector<16x128xbf16>
    %c1 = arith.constant 1 : index
    %c0_7 = arith.constant 0 : index
    %c0_8 = arith.constant 0 : index
    %8 = vector.load %arg2[%c1, %c0_7, %c0_8] : memref<6x128x128xbf16, #tpu.memory_space<vmem>>, vector<1x128x128xbf16>
    %9 = vector.shape_cast %8 : vector<1x128x128xbf16> to vector<128x128xbf16>
    %cst_9 = arith.constant dense<0.000000e+00> : vector<16x128xf32>
    %10 = tpu.matmul %7, %9, %cst_9 {dimension_numbers = #tpu.dot_dimension_numbers<[1], [0], [0], [1], [0, 0, 1, 1], [], []>} : vector<16x128xbf16>, vector<128x128xbf16>, vector<16x128xf32> -> vector<16x128xf32>
    %11 = arith.addf %6, %10 : vector<16x128xf32>
    %12 = vector.extract_strided_slice %1 {offsets = [2, 0], sizes = [16, 128], strides = [1, 1]} : vector<18x128xbf16> to vector<16x128xbf16>
    %c2 = arith.constant 2 : index
    %c0_10 = arith.constant 0 : index
    %c0_11 = arith.constant 0 : index
    %13 = vector.load %arg2[%c2, %c0_10, %c0_11] : memref<6x128x128xbf16, #tpu.memory_space<vmem>>, vector<1x128x128xbf16>
    %14 = vector.shape_cast %13 : vector<1x128x128xbf16> to vector<128x128xbf16>
    %cst_12 = arith.constant dense<0.000000e+00> : vector<16x128xf32>
    %15 = tpu.matmul %12, %14, %cst_12 {dimension_numbers = #tpu.dot_dimension_numbers<[1], [0], [0], [1], [0, 0, 1, 1], [], []>} : vector<16x128xbf16>, vector<128x128xbf16>, vector<16x128xf32> -> vector<16x128xf32>
    %16 = arith.addf %11, %15 : vector<16x128xf32>
    %17 = vector.extract_strided_slice %2 {offsets = [0, 0], sizes = [1, 128], strides = [1, 1]} : vector<4x128xf32> to vector<1x128xf32>
    %18 = vector.broadcast %17 : vector<1x128xf32> to vector<16x128xf32>
    %19 = arith.mulf %16, %18 : vector<16x128xf32>
    %20 = vector.extract_strided_slice %2 {offsets = [1, 0], sizes = [1, 128], strides = [1, 1]} : vector<4x128xf32> to vector<1x128xf32>
    %21 = vector.broadcast %20 : vector<1x128xf32> to vector<16x128xf32>
    %22 = arith.addf %19, %21 : vector<16x128xf32>
    %cst_13 = arith.constant 0.000000e+00 : f32
    %23 = vector.broadcast %cst_13 : f32 to vector<16x128xf32>
    %24 = arith.maximumf %22, %23 : vector<16x128xf32>
    %25 = arith.truncf %24 : vector<16x128xf32> to vector<16x128xbf16>
    %cst_14 = arith.constant 0.000000e+00 : bf16
    %26 = vector.broadcast %cst_14 : bf16 to vector<1x128xbf16>
    %27 = tpu.concatenate %26, %25, %26 in 0 : vector<1x128xbf16>, vector<16x128xbf16>, vector<1x128xbf16> -> vector<18x128xbf16>
    %28 = vector.extract_strided_slice %27 {offsets = [0, 0], sizes = [16, 128], strides = [1, 1]} : vector<18x128xbf16> to vector<16x128xbf16>
    %c3 = arith.constant 3 : index
    %c0_15 = arith.constant 0 : index
    %c0_16 = arith.constant 0 : index
    %29 = vector.load %arg2[%c3, %c0_15, %c0_16] : memref<6x128x128xbf16, #tpu.memory_space<vmem>>, vector<1x128x128xbf16>
    %30 = vector.shape_cast %29 : vector<1x128x128xbf16> to vector<128x128xbf16>
    %cst_17 = arith.constant dense<0.000000e+00> : vector<16x128xf32>
    %31 = tpu.matmul %28, %30, %cst_17 {dimension_numbers = #tpu.dot_dimension_numbers<[1], [0], [0], [1], [0, 0, 1, 1], [], []>} : vector<16x128xbf16>, vector<128x128xbf16>, vector<16x128xf32> -> vector<16x128xf32>
    %32 = vector.extract_strided_slice %27 {offsets = [1, 0], sizes = [16, 128], strides = [1, 1]} : vector<18x128xbf16> to vector<16x128xbf16>
    %c4 = arith.constant 4 : index
    %c0_18 = arith.constant 0 : index
    %c0_19 = arith.constant 0 : index
    %33 = vector.load %arg2[%c4, %c0_18, %c0_19] : memref<6x128x128xbf16, #tpu.memory_space<vmem>>, vector<1x128x128xbf16>
    %34 = vector.shape_cast %33 : vector<1x128x128xbf16> to vector<128x128xbf16>
    %cst_20 = arith.constant dense<0.000000e+00> : vector<16x128xf32>
    %35 = tpu.matmul %32, %34, %cst_20 {dimension_numbers = #tpu.dot_dimension_numbers<[1], [0], [0], [1], [0, 0, 1, 1], [], []>} : vector<16x128xbf16>, vector<128x128xbf16>, vector<16x128xf32> -> vector<16x128xf32>
    %36 = arith.addf %31, %35 : vector<16x128xf32>
    %37 = vector.extract_strided_slice %27 {offsets = [2, 0], sizes = [16, 128], strides = [1, 1]} : vector<18x128xbf16> to vector<16x128xbf16>
    %c5 = arith.constant 5 : index
    %c0_21 = arith.constant 0 : index
    %c0_22 = arith.constant 0 : index
    %38 = vector.load %arg2[%c5, %c0_21, %c0_22] : memref<6x128x128xbf16, #tpu.memory_space<vmem>>, vector<1x128x128xbf16>
    %39 = vector.shape_cast %38 : vector<1x128x128xbf16> to vector<128x128xbf16>
    %cst_23 = arith.constant dense<0.000000e+00> : vector<16x128xf32>
    %40 = tpu.matmul %37, %39, %cst_23 {dimension_numbers = #tpu.dot_dimension_numbers<[1], [0], [0], [1], [0, 0, 1, 1], [], []>} : vector<16x128xbf16>, vector<128x128xbf16>, vector<16x128xf32> -> vector<16x128xf32>
    %41 = arith.addf %36, %40 : vector<16x128xf32>
    %42 = vector.extract_strided_slice %1 {offsets = [1, 0], sizes = [16, 128], strides = [1, 1]} : vector<18x128xbf16> to vector<16x128xbf16>
    %43 = arith.extf %42 : vector<16x128xbf16> to vector<16x128xf32>
    %44 = vector.extract_strided_slice %2 {offsets = [2, 0], sizes = [1, 128], strides = [1, 1]} : vector<4x128xf32> to vector<1x128xf32>
    %45 = vector.broadcast %44 : vector<1x128xf32> to vector<16x128xf32>
    %46 = arith.mulf %41, %45 : vector<16x128xf32>
    %47 = vector.extract_strided_slice %2 {offsets = [3, 0], sizes = [1, 128], strides = [1, 1]} : vector<4x128xf32> to vector<1x128xf32>
    %48 = vector.broadcast %47 : vector<1x128xf32> to vector<16x128xf32>
    %49 = arith.addf %46, %48 : vector<16x128xf32>
    %50 = arith.addf %49, %43 : vector<16x128xf32>
    %cst_24 = arith.constant 0.000000e+00 : f32
    %51 = vector.broadcast %cst_24 : f32 to vector<16x128xf32>
    %52 = arith.maximumf %50, %51 : vector<16x128xf32>
    %53 = arith.truncf %52 : vector<16x128xf32> to vector<16x128xbf16>
    %54 = vector.shape_cast %53 : vector<16x128xbf16> to vector<1x16x128xbf16>
    %c0_25 = arith.constant 0 : index
    %c0_26 = arith.constant 0 : index
    %c0_27 = arith.constant 0 : index
    %55 = vector.load %arg4[%c0_25, %c0_26, %c0_27] : memref<1x16x128xbf16, #tpu.memory_space<vmem>>, vector<1x16x128xbf16>
    tpu.vector_store %arg4[%c0_25, %c0_26, %c0_27], %54 {strides = array<i32>} : memref<1x16x128xbf16, #tpu.memory_space<vmem>>, vector<1x16x128xbf16>,
    return
  }
  func.func @transform_0(%arg0: i32) -> (i32, i32, i32) {
    %c0_i32 = arith.constant 0 : i32
    %c0_i32_0 = arith.constant 0 : i32
    %c0_i32_1 = arith.constant 0 : i32
    return %arg0, %c0_i32, %c0_i32_0 : i32, i32, i32
  }
  func.func @transform_1(%arg0: i32) -> (i32, i32, i32) {
    %c0_i32 = arith.constant 0 : i32
    %c0_i32_0 = arith.constant 0 : i32
    %c0_i32_1 = arith.constant 0 : i32
    %c0_i32_2 = arith.constant 0 : i32
    return %c0_i32, %c0_i32_0, %c0_i32_1 : i32, i32, i32
  }
  func.func @transform_2(%arg0: i32) -> (i32, i32) {
    %c0_i32 = arith.constant 0 : i32
    %c0_i32_0 = arith.constant 0 : i32
    %c0_i32_1 = arith.constant 0 : i32
    return %c0_i32, %c0_i32_0 : i32, i32
  }
  func.func @transform_3(%arg0: i32) -> (i32, i32, i32) {
    %c0_i32 = arith.constant 0 : i32
    %c0_i32_0 = arith.constant 0 : i32
    %c0_i32_1 = arith.constant 0 : i32
    return %arg0, %c0_i32, %c0_i32_0 : i32, i32, i32
  }
}

</mosaic_0001>

<bundles_post_ra>
// kernel: tile.23
= control target key start
LH: loop header
LB: loop body
LE: loop exit
PB: predicated region body
PF: predicated region fallthrough
CT: control target
= control target key end

     0   :  { %s28_s0 = inlined_call_operand.vmem [shape: f32[8], index: 0, kind: input, shape index: {}]   ;;  %s29_s1 = inlined_call_operand.vmem [shape: f32[16,8], index: 1, kind: output, shape index: {}]  }
   0x1   :  { %v4_v0 = vld [vmem:[%s28_s0] ss:$0 sm:$0xff] }
   0x2   :  { %5 = vst [vmem:[%s29_s1] sm:$0xff] %v4_v0  ;;  %8 = vst [vmem:[%s29_s1 + $0x8] sm:$0xff] %v4_v0 }

// kernel: basic_block.1
= control target key start
LH: loop header
LB: loop body
LE: loop exit
PB: predicated region body
PF: predicated region fallthrough
CT: control target
= control target key end

     0   :  { %s1418_s12 = smov 0   ;;  %s1680_s0 = inlined_call_operand.vmem [shape: bf16[2,18,128], index: 0, kind: input, shape index: {}]   ;;  %s1681_s1 = inlined_call_operand.vmem [shape: bf16[6,128,128], index: 1, kind: input, shape index: {}]   ;;  %s1682_s2 = inlined_call_operand.vmem [shape: f32[4,128], index: 2, kind: input, shape index: {}]   ;;  %s1683_s3 = inlined_call_operand.vmem [shape: bf16[2,16,128], index: 3, kind: output, shape index: {}]  }
   0x1 LB: > { %s986_s13 = sadd.s32 4294967295, %s1394_s12   ;;  %p990_p0 = scmp.ge.s32.totalorder %s1394_s12, 1  ;;  %s1394_s12 = sphi %s1418_s12, %s13_s12  }
   0x2   : > { %p137_p1 = scmp.lt.s32.totalorder %s1394_s12, 3 }
   0x4   : > { %p138_p2 = pnand %p990_p0, %p137_p1 }
   0x5   : > { %v1337_v0 = vld [vmem:[%s1681_s1 + $0x40] sm:$0xff] (!%p138_p2)   ;;  %v1396_v1 = vmov (!%p138_p2), 0.0   ;;  %v1338_v2 = vld [vmem:[%s1681_s1 + $0x48] sm:$0xff] (!%p138_p2)   ;;  %vm1397_vm0 = vmmov (!%p138_p2), 0   ;;  %p161_p3 = scmp.lt.s32.totalorder (!%p138_p2), %s986_s13, 1  ;;  %v1339_v3 = vld [vmem:[%s1681_s1 + $0x50] sm:$0xff] (!%p138_p2)   ;;  %v523_v46 = vlaneseq (!%p138_p2) }
   0x6   : > { %141 = sbr.rel (%p138_p2) target bundleno = 627 (0x273), region = 32  ;;  %1190 = vmatprep.subr.bf16.mxu0 (!%p138_p2), %v1396_v1  ;;  %1250 = vmatprep.subr.bf16.mxu1 (!%p138_p2), %v1396_v1  ;;  %v1340_v4 = vld [vmem:[%s1681_s1 + $0x58] sm:$0xff] (!%p138_p2)   ;;  %v1341_v7 = vld [vmem:[%s1681_s1 + $0x60] sm:$0xff] (!%p138_p2)   ;;  %vm427_vm1 = vcmask (!%p138_p2), 1046528   ;;  %v1342_v11 = vld [vmem:[%s1681_s1 + $0x68] sm:$0xff] (!%p138_p2)   ;;  %vm547_vm3 = vcmask (!%p138_p2), 1040384  }
   0x7   : > { %1191 = vmatpush3.bf16.msra.mxu0 (!%p138_p2), %v1337_v0  ;;  %1206 = vmatprep.mubr.msk.bf16.mxu0 (!%p138_p2), %vm1397_vm0, %v1396_v1  ;;  %v1343_v14 = vld [vmem:[%s1681_s1 + $0x70] sm:$0xff] (!%p138_p2)   ;;  %v1344_v18 = vld [vmem:[%s1681_s1 + $0x78] sm:$0xff] (!%p138_p2)   ;;  %v1363_v21 = vld [vmem:[%s1681_s1 + $0x100] sm:$0xff] (!%p138_p2)   ;;  %vm217_vm2 = vsmask.f32 (!%p138_p2), 7424  ;;  %v1584_v47 = vshrl.u32 (!%p138_p2), %v523_v46, 7 }
   0x8   : > { %1192 = vmatprep.subr.bf16.mxu0 (!%p138_p2), %v1396_v1  ;;  %1266 = vmatprep.mubr.msk.bf16.mxu1 (!%p138_p2), %vm1397_vm0, %v1396_v1  ;;  %v1364_v22 = vld [vmem:[%s1681_s1 + $0x108] sm:$0xff] (!%p138_p2)   ;;  %v1347_v23 = vld [vmem:[%s1681_s1] sm:$0xff] (!%p138_p2)   ;;  %v1349_v26 = vld [vmem:[%s1681_s1 + $0x10] sm:$0xff] (!%p138_p2)   ;;  %vm548_vm4 = vsmask.f32 (!%p138_p2), 256 }
   0x9   : > { %1251 = vmatpush3.bf16.msra.mxu1 (!%p138_p2), %v1363_v21  ;;  %v1348_v25 = vld [vmem:[%s1681_s1 + $0x8] sm:$0xff] (!%p138_p2)   ;;  %v1350_v27 = vld [vmem:[%s1681_s1 + $0x18] sm:$0xff] (!%p138_p2)   ;;  %v1351_v28 = vld [vmem:[%s1681_s1 + $0x20] sm:$0xff] (!%p138_p2)   ;;  %v525_v48 = vsub.s32 (!%p138_p2), 0, %v1584_v47  ;;  %v531_v50 = vsub.s32 (!%p138_p2), 1, %v1584_v47 }
   0xa   : > { %1252 = vmatprep.subr.bf16.mxu1 (!%p138_p2), %v1396_v1  ;;  %v1352_v29 = vld [vmem:[%s1681_s1 + $0x28] sm:$0xff] (!%p138_p2)   ;;  %v1353_v30 = vld [vmem:[%s1681_s1 + $0x30] sm:$0xff] (!%p138_p2)   ;;  %v1354_v31 = vld [vmem:[%s1681_s1 + $0x38] sm:$0xff] (!%p138_p2)  }
   0xb   : > { %1193 = vmatpush3.bf16.msra.mxu0 (!%p138_p2), %v1338_v2  ;;  %v1355_v32 = vld [vmem:[%s1681_s1 + $0x80] sm:$0xff] (!%p138_p2)   ;;  %v1356_v33 = vld [vmem:[%s1681_s1 + $0x88] sm:$0xff] (!%p138_p2)   ;;  %v1357_v34 = vld [vmem:[%s1681_s1 + $0x90] sm:$0xff] (!%p138_p2)  }
   0xc   : > { %1194 = vmatprep.subr.bf16.mxu0 (!%p138_p2), %v1396_v1  ;;  %v1358_v35 = vld [vmem:[%s1681_s1 + $0x98] sm:$0xff] (!%p138_p2)   ;;  %v1359_v36 = vld [vmem:[%s1681_s1 + $0xa0] sm:$0xff] (!%p138_p2)   ;;  %v1360_v37 = vld [vmem:[%s1681_s1 + $0xa8] sm:$0xff] (!%p138_p2)  }
   0xd   : > { %s1685_s13 = smov (!%p161_p3, %s986_s13), 1  ;;  %1253 = vmatpush3.bf16.msra.mxu1 %v1364_v22  ;;  %v1361_v38 = vld [vmem:[%s1681_s1 + $0xb0] sm:$0xff]   ;;  %v1362_v39 = vld [vmem:[%s1681_s1 + $0xb8] sm:$0xff]   ;;  %v1367_v42 = vld [vmem:[%s1681_s1 + $0x120] sm:$0xff]  }
   0xe   : > { %s1326_s20 = smul.u32 12, %s1685_s13  ;;  %1254 = vmatprep.subr.bf16.mxu1 %v1396_v1  ;;  %v1365_v40 = vld [vmem:[%s1681_s1 + $0x110] sm:$0xff]   ;;  %v1366_v41 = vld [vmem:[%s1681_s1 + $0x118] sm:$0xff]   ;;  %v1368_v43 = vld [vmem:[%s1681_s1 + $0x128] sm:$0xff]   ;;  %s1128_s16 = sshll.u32 %s1685_s13, 3 }
   0xf   : > { %1195 = vmatpush3.bf16.msra.mxu0 %v1339_v3  ;;  %v1369_v44 = vld [vmem:[%s1681_s1 + $0x130] sm:$0xff]   ;;  %v1370_v45 = vld [vmem:[%s1681_s1 + $0x138] sm:$0xff]   ;;  %v1590_v49 = vld [vmem:[%s1682_s2] sm:$0xf]  ;;  %s170_s19 = scalar_lea.vmem %s1683_s3, %s1128_s16 }
  0x10   : > { %s165_s23 = scalar_lea.vmem %s1680_s0, %s1326_s20  ;;  %1196 = vmatprep.subr.bf16.mxu0 %v1396_v1  ;;  %v526_v51 = vrot.slane %v1590_v49, %v525_v48  ;;  %v532_v52 = vrot.slane %v1590_v49, %v531_v50  ;;  %vm549_vm5 = vmand %vm547_vm3, %vm548_vm4  ;;  %v1373_v21 = vld [vmem:[%s1681_s1 + $0xd0] sm:$0xff]   ;;  %v1374_v22 = vld [vmem:[%s1681_s1 + $0xd8] sm:$0xff]  }
  0x11   : > { %v1453_v5 = vld [vmem:[%s165_s23] sm:$0xff]   ;;  %v1455_v6 = vld [vmem:[%s165_s23 + $0x8] sm:$0x1]  ;;  %1255 = vmatpush3.bf16.msra.mxu1 %v1365_v40 }
  0x12   : > { %v1011_v8 = vcombine.low %v1455_v6, %v1455_v6  ;;  %v428_v9 = vrot.slane %v1453_v5, 1  ;;  %v221_v12 = vshll.u32 %v1453_v5, 16  ;;  %v219_v15 = vshrl.u32 %v1453_v5, 16  ;;  %1256 = vmatprep.subr.bf16.mxu1 %v1396_v1 }
  0x13   : > { %1197 = vmatpush3.bf16.msra.mxu0 %v1340_v4 }
  0x14   : > { %1198 = vmatprep.subr.bf16.mxu0 %v1396_v1  ;;  %v429_v10 = vrot.slane %v1011_v8, 1  ;;  %v223_v16 = vrot.slane %v221_v12, 1  ;;  %v226_v17 = vshll.u32 %v1011_v8, 16 }
  0x15   : > { %1257 = vmatpush3.bf16.msra.mxu1 %v1366_v41 }
  0x16   : > { %v1470_v13 = vsel %vm427_vm1, %v428_v9, %v429_v10  ;;  %v224_v19 = vor.u32 %v223_v16, %v219_v15  ;;  %v228_v20 = vrot.slane %v226_v17, 1  ;;  %1258 = vmatprep.subr.bf16.mxu1 %v1396_v1 }
  0x17   : > { %1199 = vmatpush3.bf16.msra.mxu0 %v1341_v7 }
  0x18   : > { %1200 = vmatprep.subr.bf16.mxu0 %v1396_v1  ;;  %v229_v24 = vsel %vm217_vm2, %v224_v19, %v228_v20  ;;  %v1372_v20 = vld [vmem:[%s1681_s1 + $0xc8] sm:$0xff]  }
  0x19   : > { %1259 = vmatpush3.bf16.msra.mxu1 %v1367_v42 }
  0x1a   : > { %1260 = vmatprep.subr.bf16.mxu1 %v1396_v1 }
  0x1b   : > { %1201 = vmatpush3.bf16.msra.mxu0 %v1342_v11 }
  0x1c   : > { %1202 = vmatprep.subr.bf16.mxu0 %v1396_v1 }
  0x1d   : > { %1261 = vmatpush3.bf16.msra.mxu1 %v1368_v43 }
  0x1e   : > { %1262 = vmatprep.subr.bf16.mxu1 %v1396_v1 }
  0x1f   : > { %1203 = vmatpush3.bf16.msra.mxu0 %v1343_v14 }
  0x20   : > { %1204 = vmatprep.subr.bf16.mxu0 %v1396_v1 }
  0x21   : > { %1263 = vmatpush3.bf16.msra.mxu1 %v1369_v44 }
  0x22   : > { %1264 = vmatprep.subr.bf16.mxu1 %v1396_v1 }
  0x23   : > { %1205 = vmatpush3.bf16.msra.mxu0 %v1344_v18  ;;  %v1371_v18 = vld [vmem:[%s1681_s1 + $0xc0] sm:$0xff]  }
  0x24   : > { %1210 = vmatprep.subr.bf16.mxu0 %v1396_v1 }
  0x25   : > { %1265 = vmatpush3.bf16.msra.mxu1 %v1370_v45 }
  0x26   : > { %1207 = vmatmul.mubr.bf16.vlgmr.msra.gmra.mrb[0].mxu0 %v229_v24  ;;  %1270 = vmatprep.subr.bf16.mxu1 %v1396_v1  ;;  %v1376_v24 = vld [vmem:[%s1681_s1 + $0xe8] sm:$0xff]  }
  0x27   : > { %1211 = vmatpush3.bf16.msra.mxu0 %v1347_v23  ;;  %1226 = vmatprep.mubr.msk.bf16.mxu0 %vm1397_vm0, %v1396_v1  ;;  %v1375_v23 = vld [vmem:[%s1681_s1 + $0xe0] sm:$0xff]  }
  0x28   : > { %1212 = vmatprep.subr.bf16.mxu0 %v1396_v1 }
  0x2b   : > { %1213 = vmatpush3.bf16.msra.mxu0 %v1348_v25  ;;  %v1377_v25 = vld [vmem:[%s1681_s1 + $0xf0] sm:$0xff]  }
  0x2c   : > { %1214 = vmatprep.subr.bf16.mxu0 %v1396_v1 }
  0x2f   : > { %1215 = vmatpush3.bf16.msra.mxu0 %v1349_v26  ;;  %v1378_v26 = vld [vmem:[%s1681_s1 + $0xf8] sm:$0xff]  }
  0x30   : > { %1216 = vmatprep.subr.bf16.mxu0 %v1396_v1 }
  0x33   : > { %1217 = vmatpush3.bf16.msra.mxu0 %v1350_v27  ;;  %v1379_v27 = vld [vmem:[%s1681_s1 + $0x140] sm:$0xff]  }
  0x34   : > { %1218 = vmatprep.subr.bf16.mxu0 %v1396_v1 }
  0x37   : > { %1219 = vmatpush3.bf16.msra.mxu0 %v1351_v28  ;;  %v1380_v28 = vld [vmem:[%s1681_s1 + $0x148] sm:$0xff]  }
  0x38   : > { %1220 = vmatprep.subr.bf16.mxu0 %v1396_v1 }
  0x3b   : > { %1221 = vmatpush3.bf16.msra.mxu0 %v1352_v29  ;;  %v1381_v29 = vld [vmem:[%s1681_s1 + $0x150] sm:$0xff]  }
  0x3c   : > { %1222 = vmatprep.subr.bf16.mxu0 %v1396_v1 }
  0x3f   : > { %1223 = vmatpush3.bf16.msra.mxu0 %v1353_v30  ;;  %v1382_v30 = vld [vmem:[%s1681_s1 + $0x158] sm:$0xff]  }
  0x40   : > { %1224 = vmatprep.subr.bf16.mxu0 %v1396_v1 }
  0x43   : > { %1225 = vmatpush3.bf16.msra.mxu0 %v1354_v31  ;;  %v1383_v31 = vld [vmem:[%s1681_s1 + $0x160] sm:$0xff]  }
  0x44   : > { %1230 = vmatprep.subr.bf16.mxu0 %v1396_v1 }
  0x46   : > { %1227 = vmatmul.mubr.bf16.vlgmr.msra.gmra.mrb[0].mxu0 %v1453_v5 }
  0x47   : > { %1231 = vmatpush3.bf16.msra.mxu0 %v1355_v32  ;;  %1246 = vmatprep.mubr.msk.bf16.mxu0 %vm1397_vm0, %v1396_v1  ;;  %v1384_v32 = vld [vmem:[%s1681_s1 + $0x168] sm:$0xff]  }
  0x48   : > { %1232 = vmatprep.subr.bf16.mxu0 %v1396_v1 }
  0x4b   : > { %1233 = vmatpush3.bf16.msra.mxu0 %v1356_v33  ;;  %v1385_v33 = vld [vmem:[%s1681_s1 + $0x170] sm:$0xff]  }
  0x4c   : > { %1234 = vmatprep.subr.bf16.mxu0 %v1396_v1 }
  0x4f   : > { %1235 = vmatpush3.bf16.msra.mxu0 %v1357_v34  ;;  %v1386_v34 = vld [vmem:[%s1681_s1 + $0x178] sm:$0xff]  }
  0x50   : > { %1236 = vmatprep.subr.bf16.mxu0 %v1396_v1 }
  0x53   : > { %1237 = vmatpush3.bf16.msra.mxu0 %v1358_v35  ;;  %v896_v35 = vsub.s32 2, %v1584_v47 }
  0x54   : > { %1238 = vmatprep.subr.bf16.mxu0 %v1396_v1 }
  0x55   : > { %v897_v40 = vrot.slane %v1590_v49, %v896_v35 }
  0x57   : > { %1239 = vmatpush3.bf16.msra.mxu0 %v1359_v36  ;;  %v891_v36 = vunpack.c.l.bf16 %v1453_v5 }
  0x58   : > { %1240 = vmatprep.subr.bf16.mxu0 %v1396_v1 }
  0x59   : > { %v910_v41 = vrot.slane %v891_v36, 1 }
  0x5b   : > { %1241 = vmatpush3.bf16.msra.mxu0 %v1360_v37  ;;  %v892_v37 = vunpack.c.h.bf16 %v1453_v5 }
  0x5c   : > { %1242 = vmatprep.subr.bf16.mxu0 %v1396_v1 }
  0x5d   : > { %v911_v42 = vrot.slane %v892_v37, 1 }
  0x5f   : > { %1243 = vmatpush3.bf16.msra.mxu0 %v1361_v38  ;;  %v902_v38 = vsub.s32 3, %v1584_v47  ;;  %v912_v48 = vsel %vm427_vm1, %v910_v41, %v911_v42 }
  0x60   : > { %1244 = vmatprep.subr.bf16.mxu0 %v1396_v1 }
  0x61   : > { %v903_v43 = vrot.slane %v1590_v49, %v902_v38 }
  0x63   : > { %1245 = vmatpush3.bf16.msra.mxu0 %v1362_v39  ;;  %v893_v39 = vunpack.c.l.bf16 %v1455_v6 }
  0x65   : > { %v913_v44 = vrot.slane %v893_v39, 1 }
  0x66   : > { %1247 = vmatmul.mubr.bf16.vlgmr.msra.gmra.mrb[0].mxu0 %v1470_v13 }
  0x67   : > { %v914_v47 = vsel %vm427_vm1, %v911_v42, %v913_v44 }
 0x139   : > { %v514_v53 = vpop.f32.mrb[0].mxu0 }
 0x13a   : > { %v527_v54 = vmul.f32 %v526_v51, %v514_v53  ;;  %v1248_v55 = vpop.f32.mrb[1].mxu0 }
 0x13b   : > { %v517_v56 = vpop.f32.mrb[2].mxu0 }
 0x13c   : > { %v533_v57 = vadd.f32 %v532_v52, %v527_v54  ;;  %v528_v58 = vmul.f32 %v526_v51, %v517_v56  ;;  %v1249_v59 = vpop.f32.mrb[3].mxu0 }
 0x13e   : > { %v534_v60 = vadd.f32 %v532_v52, %v528_v58  ;;  %v535_v61 = vmax.f32 %v533_v57, 0.0 }
 0x140   : > { %v536_v62 = vmax.f32 %v534_v60, 0.0 }
 0x142   : > { %v537_v63 = vpack.c.bf16 %v536_v62, %v535_v61 }
 0x144   : > { %v539_v0 = vshrl.u32 %v537_v63, 16  ;;  %v542_v3 = vshll.u32 %v537_v63, 16 }
 0x146   : > { %v541_v2 = vrot.slane %v539_v0, 7 }
 0x148   : > { %v544_v4 = vor.u32 %v542_v3, %v541_v2  ;;  %v551_v7 = vsel %vm549_vm5, %v541_v2, 0 }
 0x149   : > { %v594_v10 = vshll.u32 %v551_v7, 16  ;;  %v797_v12 = vrot.slane %v551_v7, 1 }
 0x14a   : > { %v550_v8 = vsel %vm549_vm5, 0, %v544_v4 }
 0x14b   : > { %v589_v9 = vshll.u32 %v550_v8, 16  ;;  %v796_v11 = vrot.slane %v550_v8, 1  ;;  %v587_v13 = vshrl.u32 %v550_v8, 16  ;;  %v596_v17 = vrot.slane %v594_v10, 1 }
 0x14d   : > { %v591_v14 = vrot.slane %v589_v9, 1  ;;  %v798_v15 = vsel %vm427_vm1, %v796_v11, %v797_v12 }
 0x14f   : > { %v592_v16 = vor.u32 %v591_v14, %v587_v13 }
 0x151   : > { %v597_v19 = vsel %vm217_vm2, %v592_v16, %v596_v17 }
 0x152   : > { %1267 = vmatmul.mubr.bf16.vlgmr.msra.gmra.mrb[0].mxu1 %v597_v19 }
 0x153   : > { %1271 = vmatpush3.bf16.msra.mxu1 %v1371_v18  ;;  %1286 = vmatprep.mubr.msk.bf16.mxu1 %vm1397_vm0, %v1396_v1 }
 0x154   : > { %1272 = vmatprep.subr.bf16.mxu1 %v1396_v1 }
 0x157   : > { %1273 = vmatpush3.bf16.msra.mxu1 %v1372_v20 }
 0x158   : > { %1274 = vmatprep.subr.bf16.mxu1 %v1396_v1 }
 0x15b   : > { %1275 = vmatpush3.bf16.msra.mxu1 %v1373_v21 }
 0x15c   : > { %1276 = vmatprep.subr.bf16.mxu1 %v1396_v1 }
 0x15f   : > { %1277 = vmatpush3.bf16.msra.mxu1 %v1374_v22 }
 0x160   : > { %1278 = vmatprep.subr.bf16.mxu1 %v1396_v1 }
 0x163   : > { %1279 = vmatpush3.bf16.msra.mxu1 %v1375_v23 }
 0x164   : > { %1280 = vmatprep.subr.bf16.mxu1 %v1396_v1 }
 0x167   : > { %1281 = vmatpush3.bf16.msra.mxu1 %v1376_v24 }
 0x168   : > { %1282 = vmatprep.subr.bf16.mxu1 %v1396_v1 }
 0x16b   : > { %1283 = vmatpush3.bf16.msra.mxu1 %v1377_v25 }
 0x16c   : > { %1284 = vmatprep.subr.bf16.mxu1 %v1396_v1 }
 0x16f   : > { %1285 = vmatpush3.bf16.msra.mxu1 %v1378_v26 }
 0x170   : > { %1290 = vmatprep.subr.bf16.mxu1 %v1396_v1 }
 0x172   : > { %1287 = vmatmul.mubr.bf16.vlgmr.msra.gmra.mrb[0].mxu1 %v550_v8 }
 0x173   : > { %1291 = vmatpush3.bf16.msra.mxu1 %v1379_v27  ;;  %1306 = vmatprep.mubr.msk.bf16.mxu1 %vm1397_vm0, %v1396_v1 }
 0x174   : > { %1292 = vmatprep.subr.bf16.mxu1 %v1396_v1 }
 0x177   : > { %1293 = vmatpush3.bf16.msra.mxu1 %v1380_v28 }
 0x178   : > { %1294 = vmatprep.subr.bf16.mxu1 %v1396_v1 }
 0x17b   : > { %1295 = vmatpush3.bf16.msra.mxu1 %v1381_v29 }
 0x17c   : > { %1296 = vmatprep.subr.bf16.mxu1 %v1396_v1 }
 0x17f   : > { %1297 = vmatpush3.bf16.msra.mxu1 %v1382_v30 }
 0x180   : > { %1298 = vmatprep.subr.bf16.mxu1 %v1396_v1 }
 0x183   : > { %1299 = vmatpush3.bf16.msra.mxu1 %v1383_v31 }
 0x184   : > { %1300 = vmatprep.subr.bf16.mxu1 %v1396_v1 }
 0x187   : > { %1301 = vmatpush3.bf16.msra.mxu1 %v1384_v32 }
 0x188   : > { %1302 = vmatprep.subr.bf16.mxu1 %v1396_v1 }
 0x18b   : > { %1303 = vmatpush3.bf16.msra.mxu1 %v1385_v33 }
 0x18c   : > { %1304 = vmatprep.subr.bf16.mxu1 %v1396_v1 }
 0x18f   : > { %1305 = vmatpush3.bf16.msra.mxu1 %v1386_v34 }
 0x192   : > { %1307 = vmatmul.mubr.bf16.vlgmr.msra.gmra.mrb[0].mxu1 %v798_v15 }
 0x265   : > { %v882_v1 = vpop.f32.mrb[0].mxu1 }
 0x266   : > { %v898_v45 = vmul.f32 %v897_v40, %v882_v1  ;;  %v1308_v46 = vpop.f32.mrb[1].mxu1 }
 0x267   : > { %v885_v50 = vpop.f32.mrb[2].mxu1 }
 0x268   : > { %v904_v51 = vadd.f32 %v903_v43, %v898_v45  ;;  %v899_v5 = vmul.f32 %v897_v40, %v885_v50  ;;  %v1309_v52 = vpop.f32.mrb[3].mxu1 }
 0x26a   : > { %v917_v6 = vadd.f32 %v912_v48, %v904_v51  ;;  %v905_v53 = vadd.f32 %v903_v43, %v899_v5 }
 0x26c   : > { %v918_v54 = vadd.f32 %v914_v47, %v905_v53  ;;  %v919_v55 = vmax.f32 %v917_v6, 0.0 }
 0x26e   : > { %v920_v56 = vmax.f32 %v918_v54, 0.0 }
 0x270   : > { %v1134_v49 = vpack.c.bf16 %v920_v56, %v919_v55 }
 0x272   : > { %1135 = vst [vmem:[%s170_s19] sm:$0xff] %v1134_v49  }
 0x273 PF: > { %s13_s12 = sadd.s32 1, %s1394_s12  }
 0x274   : > { %p10_p4 = scmp.ge.s32.totalorder %s13_s12, 4  }
 0x276   :  { %12 = sbr.rel (!%p10_p4) target bundleno = 1 (0x1), region = 67 }

</bundles_post_ra>
